<compile_context>
chip_gen: v7x
topology: tpu7x:2x2x1
jax: 0.10.0
libtpu: 0.0.40
codegen_flags: <defaults>
</compile_context>

<pallas_src>
import functools
import math

import jax
import jax.numpy as jnp
from jax.experimental import pallas as pl
from jax.experimental.pallas import tpu as pltpu


_NEG_INF = -1e10  # same constant the reference module uses


def _vmem_limit_bytes():
    """Per-generation scoped-VMEM budget: ~3/4 of physical, capped at 96 MiB.
    v5e/v6e (128 MiB)  -> 96 MiB ; v7x (64 MiB) -> 48 MiB."""
    cap = 128 * 1024 * 1024
    try:
        cap = int(getattr(pltpu.get_tpu_info(), "vmem_capacity_bytes", cap))
    except Exception:
        pass
    return min(cap * 3 // 4, 96 * 1024 * 1024)


def _pick_tile(dim, preferred, aligns):
    """Largest tile <= preferred that divides `dim` and is a multiple of one of `aligns`
    (tried in order, largest alignment first). Falls back to the full extent."""
    if dim <= preferred:
        return dim
    for align in aligns:
        if align > preferred:
            continue
        t = (preferred // align) * align
        while t >= align:
            if dim % t == 0:
                return t
            t -= align
    return dim


# ----------------------------------------------------------------------------
# Kernel 1: Conv1D  ==  torch.addmm(bias, x.view(-1, nx), weight)
# ----------------------------------------------------------------------------
def _linear_kernel(x_ref, w_ref, b_ref, o_ref, acc_ref, *, mxu_dtype):
    k = pl.program_id(2)

    @pl.when(k == 0)
    def _():
        acc_ref[...] = jnp.zeros_like(acc_ref)

    x = x_ref[...]
    w = w_ref[...]
    if mxu_dtype is not None:
        if x.dtype != mxu_dtype:
            x = x.astype(mxu_dtype)
        if w.dtype != mxu_dtype:
            w = w.astype(mxu_dtype)
    acc_ref[...] += jnp.dot(x, w, preferred_element_type=jnp.float32)

    @pl.when(k == pl.num_programs(2) - 1)
    def _():
        o_ref[...] = (acc_ref[...] + b_ref[...].astype(jnp.float32)).astype(o_ref.dtype)


def conv1d(x2d, w, b, *, tm=1024, tn=1024, tk=512, mxu_dtype=jnp.bfloat16):
    """y = x2d @ w + b   ([M,K] @ [K,N] + [N]) with f32 accumulation."""
    M, K = x2d.shape
    N = w.shape[1]
    if mxu_dtype is not None and w.dtype != mxu_dtype:
        # One-time weight cast: the (tk,tn) weight tile is re-streamed M/tm times, so bf16
        # HBM storage halves the dominant HBM stream of this (weight-bound) matmul.
        w = w.astype(mxu_dtype)
    tm = _pick_tile(M, tm, (256, 128, 8))
    tn = _pick_tile(N, tn, (256, 128))
    tk = _pick_tile(K, tk, (256, 128))
    grid = (M // tm, N // tn, K // tk)
    kern = functools.partial(_linear_kernel, mxu_dtype=mxu_dtype)
    return pl.pallas_call(
        kern,
        out_shape=jax.ShapeDtypeStruct((M, N), x2d.dtype),
        grid_spec=pltpu.PrefetchScalarGridSpec(
            num_scalar_prefetch=0,
            grid=grid,
            in_specs=[
                pl.BlockSpec((tm, tk), lambda i, j, k: (i, k)),
                pl.BlockSpec((tk, tn), lambda i, j, k: (k, j)),
                pl.BlockSpec((1, tn), lambda i, j, k: (0, j)),
            ],
            out_specs=pl.BlockSpec((tm, tn), lambda i, j, k: (i, j)),
            scratch_shapes=[pltpu.VMEM((tm, tn), jnp.float32)],
        ),
        compiler_params=pltpu.CompilerParams(
            dimension_semantics=("parallel", "parallel", "arbitrary"),
            vmem_limit_bytes=_vmem_limit_bytes(),
        ),
    )(x2d, w, b.reshape(1, N))


# ----------------------------------------------------------------------------
# Kernel 2: causal self-attention, flash-style online softmax.
#   Grid = (B, head_blocks, T/tq, T/tkv).  Each step sees a head-block of width hpb*d columns
#   of the head-contiguous activation, so the output store is lane-dense and no
#   split_heads/merge_heads transposes are needed.
# ----------------------------------------------------------------------------
def _flash_attn_kernel(q_ref, k_ref, v_ref, o_ref, m_sc, l_sc, acc_sc,
                       *, hpb, d, scale, mxu_dtype):
    qi = pl.program_id(2)
    ki = pl.program_id(3)
    tq = q_ref.shape[1]
    tkv = k_ref.shape[1]
    cdt = q_ref.dtype if mxu_dtype is None else mxu_dtype
    inv_sqrt_d = 1.0 / math.sqrt(d)

    @pl.when(ki == 0)
    def _():
        m_sc[...] = jnp.full_like(m_sc, -jnp.inf)
        l_sc[...] = jnp.zeros_like(l_sc)
        acc_sc[...] = jnp.zeros_like(acc_sc)

    q_start = qi * tq
    k_start = ki * tkv
    any_visible = k_start <= q_start + (tq - 1)        # tile intersects the causal triangle
    all_visible = (k_start + tkv - 1) <= q_start       # tile fully below the diagonal

    def step(masked):
        mask = None
        if masked:
            # Causal mask generated in-kernel (no [T,T] HBM mask); only diagonal tiles pay it.
            row = q_start + jax.lax.broadcasted_iota(jnp.int32, (tq, tkv), 0)
            col = k_start + jax.lax.broadcasted_iota(jnp.int32, (tq, tkv), 1)
            mask = row >= col
        for h in range(hpb):                            # hpb is small (2 for GPT-2 d=64)
            sl = slice(h * d, (h + 1) * d)
            q = q_ref[0, :, sl]
            if scale:
                q = q * inv_sqrt_d                      # scale [tq,d] q, not the [tq,tkv] scores
            q = q.astype(cdt)
            k = k_ref[0, :, sl].astype(cdt)
            v = v_ref[0, :, sl].astype(cdt)

            # q @ k^T without materializing a transposed copy of k
            s = jax.lax.dot_general(q, k, (((1,), (1,)), ((), ())),
                                    preferred_element_type=jnp.float32)   # [tq, tkv] f32
            if masked:
                s = jnp.where(mask, s, _NEG_INF)

            m_prev = m_sc[h]                                              # [tq, 1]
            m_new = jnp.maximum(m_prev, jnp.max(s, axis=-1, keepdims=True))
            alpha = jnp.exp(m_prev - m_new)
            p = jnp.exp(s - m_new)                                        # [tq, tkv] f32
            l_sc[h] = alpha * l_sc[h] + jnp.sum(p, axis=-1, keepdims=True)
            acc_sc[h] = alpha * acc_sc[h] + jax.lax.dot_general(
                p.astype(cdt), v, (((1,), (0,)), ((), ())),
                preferred_element_type=jnp.float32)                       # [tq, d]
            m_sc[h] = m_new

    @pl.when(all_visible)
    def _():
        step(masked=False)          # interior tile: no mask build / select

    @pl.when(jnp.logical_and(any_visible, jnp.logical_not(all_visible)))
    def _():
        step(masked=True)           # diagonal tile: apply causal mask

    @pl.when(ki == pl.num_programs(3) - 1)
    def _():
        # exact divide (bit-friendly); runs once per output tile so the cost is negligible
        outs = [acc_sc[h] / l_sc[h] for h in range(hpb)]
        # single lane-dense [tq, hpb*d] store
        o_ref[0] = jnp.concatenate(outs, axis=-1).astype(o_ref.dtype)


def attention_core(qkv, *, nx, n_head, scale, tq=512, tkv=512, mxu_dtype=jnp.bfloat16):
    """Causal flash attention on the fused [B, T, 3*nx] QKV activation. Returns [B, T, nx]."""
    B, T, three_nx = qkv.shape
    assert three_nx == 3 * nx
    d = nx // n_head

    # heads-per-block: smallest divisor of n_head whose lane width hpb*d is 128-aligned
    # (GPT-2 d=64 -> head pairs).  Fallback: all heads per block with full-width slices.
    hpb = None
    for c in range(1, n_head + 1):
        if n_head % c == 0 and (c * d) % 128 == 0:
            hpb = c
            break
    fused = hpb is not None
    if not fused:
        hpb = n_head
    W = hpb * d
    HB = n_head // hpb

    tq = _pick_tile(T, tq, (256, 128, 8))
    tkv = _pick_tile(T, tkv, (256, 128, 8))
    grid = (B, HB, T // tq, T // tkv)

    # Clamp the k/v block index to the last tile intersecting the causal triangle so the
    # fully-masked (skipped) steps do not trigger new k/v DMAs.
    def kv_row(qi, ki):
        return jnp.minimum(ki, (qi * tq + tq - 1) // tkv)

    if fused:
        # three windows onto the same HBM buffer: no XLA q/k/v slice round-trips
        q_in = k_in = v_in = qkv
        k_col = nx // W
        v_col = 2 * nx // W
    else:
        q_in = qkv[:, :, :nx]
        k_in = qkv[:, :, nx:2 * nx]
        v_in = qkv[:, :, 2 * nx:]
        k_col = v_col = 0

    q_spec = pl.BlockSpec((1, tq, W), lambda b, hb, qi, ki: (b, qi, hb))
    k_spec = pl.BlockSpec((1, tkv, W), lambda b, hb, qi, ki: (b, kv_row(qi, ki), k_col + hb))
    v_spec = pl.BlockSpec((1, tkv, W), lambda b, hb, qi, ki: (b, kv_row(qi, ki), v_col + hb))
    o_spec = pl.BlockSpec((1, tq, W), lambda b, hb, qi, ki: (b, qi, hb))

    kern = functools.partial(_flash_attn_kernel, hpb=hpb, d=d, scale=scale,
                             mxu_dtype=mxu_dtype)
    return pl.pallas_call(
        kern,
        out_shape=jax.ShapeDtypeStruct((B, T, nx), qkv.dtype),
        grid_spec=pltpu.PrefetchScalarGridSpec(
            num_scalar_prefetch=0,
            grid=grid,
            in_specs=[q_spec, k_spec, v_spec],
            out_specs=o_spec,
            scratch_shapes=[
                pltpu.VMEM((hpb, tq, 1), jnp.float32),   # running max   (only hpb rows -> small)
                pltpu.VMEM((hpb, tq, 1), jnp.float32),   # running sum
                pltpu.VMEM((hpb, tq, d), jnp.float32),   # output accumulator
            ],
        ),
        compiler_params=pltpu.CompilerParams(
            dimension_semantics=("parallel", "parallel", "parallel", "arbitrary"),
            vmem_limit_bytes=_vmem_limit_bytes(),
        ),
    )(q_in, k_in, v_in)


# ----------------------------------------------------------------------------
# Full Attention.forward (layer_past=None)
# ----------------------------------------------------------------------------
def init_attention_params(key, nx):
    k1, k2 = jax.random.split(key)
    return {
        "c_attn_w": 0.02 * jax.random.normal(k1, (nx, 3 * nx), jnp.float32),
        "c_attn_b": jnp.zeros((3 * nx,), jnp.float32),
        "c_proj_w": 0.02 * jax.random.normal(k2, (nx, nx), jnp.float32),
        "c_proj_b": jnp.zeros((nx,), jnp.float32),
    }


def attention_forward(params, x, *, n_head, n_ctx, scale=True, mxu_dtype=jnp.bfloat16):
    """Returns (a, present) exactly like Attention.forward with layer_past=None."""
    B, T, nx = x.shape
    assert nx % n_head == 0
    assert T <= n_ctx
    d = nx // n_head

    # c_attn (Conv1D nx -> 3*nx); head-contiguous columns == split_heads without transposes.
    qkv = conv1d(x.reshape(B * T, nx), params["c_attn_w"], params["c_attn_b"],
                 mxu_dtype=mxu_dtype).reshape(B, T, 3 * nx)

    # present = stack((key.transpose(-2,-1), value)) -> [2, B, H, T, d] (module's exact layout)
    kv = qkv[:, :, nx:].reshape(B, T, 2, n_head, d)
    present = kv.transpose(2, 0, 3, 1, 4)

    # fused causal flash attention directly on qkv (merged-heads, lane-dense output)
    a = attention_core(qkv, nx=nx, n_head=n_head, scale=scale, mxu_dtype=mxu_dtype)

    # c_proj (Conv1D nx -> nx)
    a = conv1d(a.reshape(B * T, nx), params["c_proj_w"], params["c_proj_b"],
               mxu_dtype=mxu_dtype).reshape(B, T, nx)
    return a, present


if __name__ == "__main__":
    def ref_forward(params, x, n_head, scale=True):
        B, T, nx = x.shape
        d = nx // n_head
        qkv = x.reshape(B * T, nx) @ params["c_attn_w"] + params["c_attn_b"]
        qkv = qkv.reshape(B, T, 3 * nx)
        q, k, v = jnp.split(qkv, 3, axis=2)

        def heads(t):
            return t.reshape(B, T, n_head, d).transpose(0, 2, 1, 3)

        q, k, v = heads(q), heads(k), heads(v)
        w = jnp.einsum("bhqd,bhkd->bhqk", q, k)
        if scale:
            w = w / math.sqrt(d)
        mask = jnp.tril(jnp.ones((T, T), jnp.float32))
        w = w * mask - 1e10 * (1.0 - mask)
        p = jax.nn.softmax(w, axis=-1)
        o = jnp.einsum("bhqk,bhkd->bhqd", p, v)
        o = o.transpose(0, 2, 1, 3).reshape(B * T, nx)
        a = (o @ params["c_proj_w"] + params["c_proj_b"]).reshape(B, T, nx)
        present = jnp.stack((k, v))
        return a, present

    root = jax.random.PRNGKey(0)
    # (B, T, nx, n_head): first config exercises the fused-QKV / lane-dense head-block fast path
    # (hpb*d == 128); second exercises the small unaligned fallback path.
    configs = [(2, 16, 128, 4), (2, 8, 32, 4)]

    for (B, T, nx, n_head) in configs:
        d = nx // n_head
        k_param, k_x = jax.random.split(jax.random.fold_in(root, nx))
        params = init_attention_params(k_param, nx)
        x = jax.random.normal(k_x, (B, T, nx), jnp.float32)

        with jax.default_matmul_precision("float32"):
            a_ref, present_ref = ref_forward(params, x, n_head, scale=True)

        # f32 MXU path: should track the full-precision reference tightly.
        a32, present = attention_forward(params, x, n_head=n_head, n_ctx=T,
                                         scale=True, mxu_dtype=None)
        jax.block_until_ready((a32, present))
        assert a32.shape == (B, T, nx)
        assert present.shape == (2, B, n_head, T, d)
        assert jnp.allclose(present, present_ref, rtol=1e-3, atol=1e-4), "present mismatch"
        assert jnp.allclose(a32, a_ref, rtol=1e-3, atol=1e-4), "f32 path mismatch"

        # default bf16-MXU / f32-accumulate path (production setting): looser tolerance.
        abf, _ = attention_forward(params, x, n_head=n_head, n_ctx=T, scale=True)
        jax.block_until_ready(abf)
        assert jnp.allclose(abf, a_ref, rtol=3e-2, atol=2e-3), "bf16 path mismatch"

    print("KERNEL_OK")
</pallas_src>

<mosaic_0001>
module attributes {stable_mosaic.version = 11 : i64} {
  func.func @_linear_kernel(%arg0: i32, %arg1: i32, %arg2: i32, %arg3: memref<32x128xf32, #tpu.memory_space<vmem>>, %arg4: memref<128x384xf32, #tpu.memory_space<vmem>>, %arg5: memref<1x384xf32, #tpu.memory_space<vmem>>, %arg6: memref<32x384xf32, #tpu.memory_space<vmem>>, %arg7: memref<32x384xf32, #tpu.memory_space<vmem>>) attributes {dimension_semantics = [#tpu.dimension_semantics<parallel>, #tpu.dimension_semantics<parallel>, #tpu.dimension_semantics<arbitrary>], iteration_bounds = array<i64: 1, 1, 1>, scalar_prefetch = 0 : i64, scratch_operands = 1 : i64, tpu.core_type = #tpu.core_type<tc>, window_params = [{transform_indices = @transform_0, window_bounds = array<i64: 32, 128>}, {transform_indices = @transform_1, window_bounds = array<i64: 128, 384>}, {transform_indices = @transform_2, window_bounds = array<i64: 1, 384>}, {transform_indices = @transform_3, window_bounds = array<i64: 32, 384>}]} {
    %c0_i32 = arith.constant 0 : i32
    %0 = arith.cmpi eq, %arg2, %c0_i32 : i32
    %1 = arith.extui %0 : i1 to i32
    %c0_i32_0 = arith.constant 0 : i32
    %2 = arith.cmpi ne, %1, %c0_i32_0 : i32
    scf.if %2 {
      %cst_10 = arith.constant 0.000000e+00 : f32
      %12 = vector.broadcast %cst_10 : f32 to vector<32x384xf32>
      %c0_11 = arith.constant 0 : index
      %c0_12 = arith.constant 0 : index
      %13 = vector.load %arg7[%c0_11, %c0_12] : memref<32x384xf32, #tpu.memory_space<vmem>>, vector<32x384xf32>
      tpu.vector_store %arg7[%c0_11, %c0_12], %12 {strides = array<i32>} : memref<32x384xf32, #tpu.memory_space<vmem>>, vector<32x384xf32>,
    } else {
    }
    %c0 = arith.constant 0 : index
    %c0_1 = arith.constant 0 : index
    %3 = vector.load %arg3[%c0, %c0_1] : memref<32x128xf32, #tpu.memory_space<vmem>>, vector<32x128xf32>
    %c0_2 = arith.constant 0 : index
    %c0_3 = arith.constant 0 : index
    %4 = vector.load %arg4[%c0_2, %c0_3] : memref<128x384xf32, #tpu.memory_space<vmem>>, vector<128x384xf32>
    %c0_4 = arith.constant 0 : index
    %c0_5 = arith.constant 0 : index
    %5 = vector.load %arg7[%c0_4, %c0_5] : memref<32x384xf32, #tpu.memory_space<vmem>>, vector<32x384xf32>
    %cst = arith.constant dense<0.000000e+00> : vector<32x384xf32>
    %6 = tpu.matmul %3, %4, %cst {dimension_numbers = #tpu.dot_dimension_numbers<[1], [0], [0], [1], [0, 0, 1, 1], [], []>} : vector<32x128xf32>, vector<128x384xf32>, vector<32x384xf32> -> vector<32x384xf32>
    %7 = arith.addf %5, %6 : vector<32x384xf32>
    %c0_6 = arith.constant 0 : index
    %c0_7 = arith.constant 0 : index
    %8 = vector.load %arg7[%c0_6, %c0_7] : memref<32x384xf32, #tpu.memory_space<vmem>>, vector<32x384xf32>
    tpu.vector_store %arg7[%c0_6, %c0_7], %7 {strides = array<i32>} : memref<32x384xf32, #tpu.memory_space<vmem>>, vector<32x384xf32>,
    %c0_i32_8 = arith.constant 0 : i32
    %9 = arith.cmpi eq, %arg2, %c0_i32_8 : i32
    %10 = arith.extui %9 : i1 to i32
    %c0_i32_9 = arith.constant 0 : i32
    %11 = arith.cmpi ne, %10, %c0_i32_9 : i32
    scf.if %11 {
      %c0_10 = arith.constant 0 : index
      %c0_11 = arith.constant 0 : index
      %12 = vector.load %arg7[%c0_10, %c0_11] : memref<32x384xf32, #tpu.memory_space<vmem>>, vector<32x384xf32>
      %c0_12 = arith.constant 0 : index
      %c0_13 = arith.constant 0 : index
      %13 = vector.load %arg5[%c0_12, %c0_13] : memref<1x384xf32, #tpu.memory_space<vmem>>, vector<1x384xf32>
      %14 = vector.broadcast %13 : vector<1x384xf32> to vector<32x384xf32>
      %15 = arith.addf %12, %14 : vector<32x384xf32>
      %c0_14 = arith.constant 0 : index
      %c0_15 = arith.constant 0 : index
      %16 = vector.load %arg6[%c0_14, %c0_15] : memref<32x384xf32, #tpu.memory_space<vmem>>, vector<32x384xf32>
      tpu.vector_store %arg6[%c0_14, %c0_15], %15 {strides = array<i32>} : memref<32x384xf32, #tpu.memory_space<vmem>>, vector<32x384xf32>,
    } else {
    }
    return
  }
  func.func @transform_0(%arg0: i32, %arg1: i32, %arg2: i32) -> (i32, i32) {
    %c0_i32 = arith.constant 0 : i32
    return %arg0, %arg2 : i32, i32
  }
  func.func @transform_1(%arg0: i32, %arg1: i32, %arg2: i32) -> (i32, i32) {
    %c0_i32 = arith.constant 0 : i32
    return %arg2, %arg1 : i32, i32
  }
  func.func @transform_2(%arg0: i32, %arg1: i32, %arg2: i32) -> (i32, i32) {
    %c0_i32 = arith.constant 0 : i32
    %c0_i32_0 = arith.constant 0 : i32
    return %c0_i32, %arg1 : i32, i32
  }
  func.func @transform_3(%arg0: i32, %arg1: i32, %arg2: i32) -> (i32, i32) {
    %c0_i32 = arith.constant 0 : i32
    return %arg0, %arg1 : i32, i32
  }
}

</mosaic_0001>

<bundles_post_ra>
// kernel: tpu_custom_call.1
= control target key start
LH: loop header
LB: loop body
LE: loop exit
PB: predicated region body
PF: predicated region fallthrough
CT: control target
= control target key end

     0   :  { %8 = vsyncpa [#allocation4], 0  ;;  %s718_s0 = inlined_call_operand.hbm [shape: f32[32,128], index: 0, kind: input, shape index: {}]   ;;  %s719_s1 = inlined_call_operand.hbm [shape: f32[128,384], index: 1, kind: input, shape index: {}]   ;;  %s720_s2 = inlined_call_operand.hbm [shape: f32[1,384], index: 2, kind: input, shape index: {}]   ;;  %s721_s3 = inlined_call_operand.hbm [shape: f32[32,384], index: 3, kind: output, shape index: {}]  }
   0x1   :  { %9 = vsyncpa [#allocation7], 0 }
   0x2   :  { %10 = vsyncpa [#allocation5], 0  ;;  %s631_s12 = smov [#allocation6]   ;;  %s537_s16 = scalar_lea.hbm %s719_s1, 6144 }
   0x3   :  { %s28_s13 = sshll.u32 %s631_s12, 4  ;;  %p538_p0 = scmp.ne.s32.totalorder %s719_s1, %s537_s16  ;;  %s29_s13 = int_to_ptr.vmem [resolvable:$true] %s28_s13 }
   0x4   :  { %p541_p1 = scmp.lt.u32.totalorder %s537_s16, %s719_s1 }
   0x6   :  { %p543_p2 = pnand %p541_p1, %p538_p0 }
   0x8   :  { %546 = shalt.err (!%p543_p2)
}
   0x9   :  { %s547_s21 = scalar_lea.vmem %s29_s13, 6144  ;;  %p552_p4 = scmp.lt.s32.totalorder %s29_s13, %s29_s13 }
   0xa   :  { %p548_p3 = scmp.ne.s32.totalorder %s29_s13, %s547_s21  ;;  %p553_p5 = scmp.lt.s32.totalorder %s547_s21, %s547_s21 }
   0xc   :  { %p554_p6 = por %p553_p5, %p552_p4 }
   0xe   :  { %p555_p7 = pnand %p554_p6, %p548_p3 }
  0x10   :  { %558 = shalt.err (!%p555_p7)
}
  0x11   :  { %s632_s22 = smov 384   ;;  %s633_s23 = smov 24  }
  0x12   :  { %34 = dma.hbm_to_vmem [thread:$0]  %s719_s1, 6144, %s29_s13, [#allocation7], %s632_s22, %s632_s22, %s633_s23  }
  0x13   :  { %s634_s26 = smov [#allocation3]   ;;  %s559_s30 = scalar_lea.hbm %s718_s0, 512 }
  0x14   :  { %s16_s27 = sshll.u32 %s634_s26, 4  ;;  %p560_p8 = scmp.ne.s32.totalorder %s718_s0, %s559_s30  ;;  %s17_s27 = int_to_ptr.vmem [resolvable:$true] %s16_s27 }
  0x15   :  { %p563_p9 = scmp.lt.u32.totalorder %s559_s30, %s718_s0 }
  0x17   :  { %p565_p10 = pnand %p563_p9, %p560_p8 }
  0x19   :  { %568 = shalt.err (!%p565_p10)
}
  0x1a   :  { %s569_s8 = scalar_lea.vmem %s17_s27, 512  ;;  %p574_p12 = scmp.lt.s32.totalorder %s17_s27, %s17_s27 }
  0x1b   :  { %p570_p11 = scmp.ne.s32.totalorder %s17_s27, %s569_s8  ;;  %p575_p13 = scmp.lt.s32.totalorder %s569_s8, %s569_s8 }
  0x1d   :  { %p576_p0 = por %p575_p13, %p574_p12 }
  0x1f   :  { %p577_p1 = pnand %p576_p0, %p570_p11 }
  0x21   :  { %580 = shalt.err (!%p577_p1)
}
  0x22   :  { %s635_s1 = smov 128   ;;  %s636_s9 = smov 8  }
  0x23   :  { %22 = dma.hbm_to_vmem [thread:$0]  %s718_s0, 512, %s17_s27, [#allocation4], %s635_s1, %s635_s1, %s636_s9  }
  0x24   :  { %s637_s12 = smov [#allocation8]   ;;  %s581_s16 = scalar_lea.hbm %s720_s2, 48 }
  0x25   :  { %s41_s13 = sshll.u32 %s637_s12, 4  ;;  %p582_p2 = scmp.ne.s32.totalorder %s720_s2, %s581_s16  ;;  %s42_s13 = int_to_ptr.vmem [resolvable:$true] %s41_s13 }
  0x26   :  { %p585_p3 = scmp.lt.u32.totalorder %s581_s16, %s720_s2 }
  0x28   :  { %p587_p4 = pnand %p585_p3, %p582_p2 }
  0x2a   :  { %590 = shalt.err (!%p587_p4)
}
  0x2b   :  { %s591_s21 = scalar_lea.vmem %s42_s13, 48  ;;  %s595_s0 = scalar_lea.vmem %s42_s13, 64 }
  0x2c   :  { %p592_p5 = scmp.ne.s32.totalorder %s42_s13, %s591_s21  ;;  %p596_p6 = scmp.lt.s32.totalorder %s42_s13, %s42_s13 }
  0x2d   :  { %p597_p7 = scmp.lt.s32.totalorder %s595_s0, %s591_s21 }
  0x2f   :  { %p598_p8 = por %p597_p7, %p596_p6 }
  0x31   :  { %p599_p9 = pnand %p598_p8, %p592_p5 }
  0x33   :  { %602 = shalt.err (!%p599_p9)
}
  0x34   :  { %44 = dma.hbm_to_vmem [thread:$0]  %s720_s2, 48, %s42_s13, [#allocation7]  }
  0x35   :  { %625 = dma.done.wait [#allocation4], 512  }
  0x36   :  { %626 = vsyncadd [#allocation4], 4294966784 }
  0x37   :  { %627 = dma.done.wait [#allocation7], 6192  }
  0x38   :  { %628 = vsyncadd [#allocation7], 4294961104  ;;  %v638_v0 = vmov 0.0   ;;  %v75_v1 = vld [vmem:[#allocation6 + $0x8] sm:$0xff]  ;;  %v78_v2 = vld [vmem:[#allocation6 + $0x20] sm:$0xff]  ;;  %s639_s2 = smov [#allocation9]  }
  0x39   :  { %198 = vmatprep.mubr.f32.mxu0 %v638_v0  ;;  %v74_v3 = vld [vmem:[#allocation6] sm:$0xff]  ;;  %v464_v4 = vpack.c.bf16 %v78_v2, %v75_v1  ;;  %v77_v5 = vld [vmem:[#allocation6 + $0x18] sm:$0xff]  ;;  %v84_v7 = vld [vmem:[#allocation6 + $0x50] sm:$0xff]  ;;  %s393_s26 = sshll.u32 %s639_s2, 4  ;;  %s394_s26 = int_to_ptr.vmem [resolvable:$true] %s393_s26 }
  0x3a   :  { %v81_v6 = vld [vmem:[#allocation6 + $0x38] sm:$0xff]  ;;  %v466_v8 = vpack.c.bf16 %v77_v5, %v74_v3  ;;  %v80_v10 = vld [vmem:[#allocation6 + $0x30] sm:$0xff]  ;;  %v83_v11 = vld [vmem:[#allocation6 + $0x48] sm:$0xff]  ;;  %s603_s27 = scalar_lea.vmem %s394_s26, 1536  ;;  %p608_p11 = scmp.lt.s32.totalorder %s394_s26, %s394_s26 }
  0x3b   :  { %v468_v9 = vpack.c.bf16 %v84_v7, %v81_v6  ;;  %v76_v12 = vld [vmem:[#allocation6 + $0x10] sm:$0xff]  ;;  %465 = vmatprep.subr.bf16.mxu0 %v464_v4  ;;  %v79_v13 = vld [vmem:[#allocation6 + $0x28] sm:$0xff]  ;;  %v90_v15 = vld [vmem:[#allocation6 + $0x80] sm:$0xff]  ;;  %v470_v16 = vpack.c.bf16 %v83_v11, %v80_v10  ;;  %p604_p10 = scmp.ne.s32.totalorder %s394_s26, %s603_s27  ;;  %p609_p12 = scmp.lt.s32.totalorder %s603_s27, %s603_s27 }
  0x3c   :  { %v87_v14 = vld [vmem:[#allocation6 + $0x68] sm:$0xff]  ;;  %467 = vmatpush1.bf16.msra.mxu0 %v466_v8  ;;  %v496_v17 = vpack.c.bf16 %v79_v13, %v76_v12  ;;  %v82_v18 = vld [vmem:[#allocation6 + $0x40] sm:$0xff]  ;;  %v89_v21 = vld [vmem:[#allocation6 + $0x78] sm:$0xff] }
  0x3d   :  { %469 = vmatprep.subr.bf16.mxu0 %v468_v9  ;;  %v472_v19 = vpack.c.bf16 %v90_v15, %v87_v14  ;;  %v86_v20 = vld [vmem:[#allocation6 + $0x60] sm:$0xff]  ;;  %v85_v22 = vld [vmem:[#allocation6 + $0x58] sm:$0xff]  ;;  %v96_v25 = vld [vmem:[#allocation6 + $0xb0] sm:$0xff]  ;;  %v349_v14 = vlaneseq  ;;  %p610_p13 = por %p609_p12, %p608_p11 }
  0x3e   :  { %497 = vmatprep.subr.bf16.mxu1 %v496_v17  ;;  %v500_v23 = vpack.c.bf16 %v85_v22, %v82_v18  ;;  %v93_v24 = vld [vmem:[#allocation6 + $0x98] sm:$0xff]  ;;  %v88_v26 = vld [vmem:[#allocation6 + $0x70] sm:$0xff]  ;;  %v91_v27 = vld [vmem:[#allocation6 + $0x88] sm:$0xff]  ;;  %v474_v28 = vpack.c.bf16 %v89_v21, %v86_v20 }
  0x3f   :  { %499 = vmatpush3.bf16.msra.mxu1 %v496_v17  ;;  %v92_v29 = vld [vmem:[#allocation6 + $0x90] sm:$0xff]  ;;  %v504_v30 = vpack.c.bf16 %v91_v27, %v88_v26  ;;  %v476_v31 = vpack.c.bf16 %v96_v25, %v93_v24  ;;  %v95_v32 = vld [vmem:[#allocation6 + $0xa8] sm:$0xff]  ;;  %v94_v33 = vld [vmem:[#allocation6 + $0xa0] sm:$0xff]  ;;  %v350_v15 = vshrl.u32 %v349_v14, 7  ;;  %p611_p0 = pnand %p610_p13, %p604_p10 }
  0x40   :  { %471 = vmatpush1.bf16.msra.mxu0 %v470_v16  ;;  %501 = vmatprep.subr.bf16.mxu1 %v500_v23  ;;  %v97_v34 = vld [vmem:[#allocation6 + $0xb8] sm:$0xff]  ;;  %v99_v35 = vld [vmem:[#allocation6 + $0xc8] sm:$0xff]  ;;  %v102_v36 = vld [vmem:[#allocation6 + $0xe0] sm:$0xff]  ;;  %v478_v37 = vpack.c.bf16 %v95_v32, %v92_v29 }
  0x41   :  { %473 = vmatprep.subr.bf16.mxu0 %v472_v19  ;;  %v98_v38 = vld [vmem:[#allocation6 + $0xc0] sm:$0xff]  ;;  %v508_v39 = vpack.c.bf16 %v97_v34, %v94_v33  ;;  %v480_v40 = vpack.c.bf16 %v102_v36, %v99_v35  ;;  %v101_v41 = vld [vmem:[#allocation6 + $0xd8] sm:$0xff]  ;;  %v100_v42 = vld [vmem:[#allocation6 + $0xd0] sm:$0xff]  ;;  %v351_v16 = vsub.s32 0, %v350_v15  ;;  %v355_v18 = vsub.s32 1, %v350_v15 }
  0x42   :  { %v103_v43 = vld [vmem:[#allocation6 + $0xe8] sm:$0xff]  ;;  %v105_v44 = vld [vmem:[#allocation6 + $0xf8] sm:$0xff]  ;;  %v108_v45 = vld [vmem:[#allocation6 + $0x110] sm:$0xff]  ;;  %v482_v46 = vpack.c.bf16 %v101_v41, %v98_v38  ;;  %v359_v19 = vsub.s32 2, %v350_v15 }
  0x43   :  { %503 = vmatpush3.bf16.msra.mxu1 %v500_v23  ;;  %v104_v47 = vld [vmem:[#allocation6 + $0xf0] sm:$0xff]  ;;  %v512_v48 = vpack.c.bf16 %v103_v43, %v100_v42  ;;  %v70_v49 = vld [vmem:[#allocation3] sm:$0xff]  ;;  %v484_v50 = vpack.c.bf16 %v108_v45, %v105_v44  ;;  %v107_v51 = vld [vmem:[#allocation6 + $0x108] sm:$0xff] }
  0x44   :  { %475 = vmatpush1.bf16.msra.mxu0 %v474_v28  ;;  %505 = vmatprep.subr.bf16.mxu1 %v504_v30  ;;  %v106_v52 = vld [vmem:[#allocation6 + $0x100] sm:$0xff]  ;;  %v109_v53 = vld [vmem:[#allocation6 + $0x118] sm:$0xff]  ;;  %v111_v54 = vld [vmem:[#allocation6 + $0x128] sm:$0xff]  ;;  %v486_v56 = vpack.c.bf16 %v107_v51, %v104_v47 }
  0x45   :  { %477 = vmatprep.subr.bf16.mxu0 %v476_v31  ;;  %458 = vmatprep.mubr.f32.mxu1 %v70_v49  ;;  %v114_v55 = vld [vmem:[#allocation6 + $0x140] sm:$0xff]  ;;  %v516_v58 = vpack.c.bf16 %v109_v53, %v106_v52  ;;  %v113_v60 = vld [vmem:[#allocation6 + $0x138] sm:$0xff]  ;;  %v112_v61 = vld [vmem:[#allocation6 + $0x130] sm:$0xff] }
  0x46   :  { %v110_v57 = vld [vmem:[#allocation6 + $0x120] sm:$0xff]  ;;  %v488_v59 = vpack.c.bf16 %v114_v55, %v111_v54  ;;  %v115_v62 = vld [vmem:[#allocation6 + $0x148] sm:$0xff]  ;;  %v117_v63 = vld [vmem:[#allocation6 + $0x158] sm:$0xff] }
  0x47   :  { %507 = vmatpush3.bf16.msra.mxu1 %v504_v30  ;;  %v120_v1 = vld [vmem:[#allocation6 + $0x170] sm:$0xff]  ;;  %v490_v2 = vpack.c.bf16 %v113_v60, %v110_v57  ;;  %v520_v4 = vpack.c.bf16 %v115_v62, %v112_v61  ;;  %v119_v6 = vld [vmem:[#allocation6 + $0x168] sm:$0xff]  ;;  %v118_v7 = vld [vmem:[#allocation6 + $0x160] sm:$0xff] }
  0x48   :  { %479 = vmatpush1.bf16.msra.mxu0 %v478_v37  ;;  %509 = vmatprep.subr.bf16.mxu1 %v508_v39  ;;  %v116_v3 = vld [vmem:[#allocation6 + $0x150] sm:$0xff]  ;;  %v492_v5 = vpack.c.bf16 %v120_v1, %v117_v63  ;;  %v121_v8 = vld [vmem:[#allocation6 + $0x178] sm:$0xff]  ;;  %v71_v11 = vld [vmem:[#allocation3 + $0x8] sm:$0xff] }
  0x49   :  { %481 = vmatprep.subr.bf16.mxu0 %v480_v40  ;;  %v494_v9 = vpack.c.bf16 %v119_v6, %v116_v3  ;;  %v524_v10 = vpack.c.bf16 %v121_v8, %v118_v7  ;;  %v72_v12 = vld [vmem:[#allocation3 + $0x10] sm:$0xff]  ;;  %v73_v13 = vld [vmem:[#allocation3 + $0x18] sm:$0xff]  ;;  %v347_v17 = vld [vmem:[#allocation8] sm:$0x7] }
  0x4a   :  { %v352_v20 = vrot.slane %v347_v17, %v351_v16  ;;  %v356_v21 = vrot.slane %v347_v17, %v355_v18  ;;  %v360_v23 = vrot.slane %v347_v17, %v359_v19 }
  0x4b   :  { %511 = vmatpush3.bf16.msra.mxu1 %v508_v39 }
  0x4c   :  { %483 = vmatpush1.bf16.msra.mxu0 %v482_v46  ;;  %513 = vmatprep.subr.bf16.mxu1 %v512_v48 }
  0x4d   :  { %485 = vmatprep.subr.bf16.mxu0 %v484_v50 }
  0x4f   :  { %515 = vmatpush3.bf16.msra.mxu1 %v512_v48 }
  0x50   :  { %487 = vmatpush1.bf16.msra.mxu0 %v486_v56  ;;  %517 = vmatprep.subr.bf16.mxu1 %v516_v58 }
  0x51   :  { %489 = vmatprep.subr.bf16.mxu0 %v488_v59 }
  0x53   :  { %519 = vmatpush3.bf16.msra.mxu1 %v516_v58 }
  0x54   :  { %491 = vmatpush1.bf16.msra.mxu0 %v490_v2  ;;  %521 = vmatprep.subr.bf16.mxu1 %v520_v4 }
  0x55   :  { %493 = vmatprep.subr.bf16.mxu0 %v492_v5 }
  0x57   :  { %523 = vmatpush3.bf16.msra.mxu1 %v520_v4 }
  0x58   :  { %495 = vmatpush1.bf16.msra.mxu0 %v494_v9  ;;  %525 = vmatprep.subr.bf16.mxu1 %v524_v10 }
  0x5b   :  { %199 = vmatmul.mubr.f32.vlgmr.msra.gmra.mrb[0].mxu0 %v70_v49  ;;  %527 = vmatpush3.bf16.msra.mxu1 %v524_v10 }
  0x5c   :  { %204 = vmatprep.mubr.f32.mxu0 %v638_v0 }
  0x5e   :  { %459 = vmatmul.mubr.f32.vlgmr.msra.gmra.mrb[0].mxu1 %v71_v11 }
  0x5f   :  { %205 = vmatmul.mubr.f32.gmra.mrb[2].mxu0 %v71_v11  ;;  %461 = vmatprep.mubr.f32.mxu1 %v72_v12 }
  0x60   :  { %210 = vmatprep.mubr.f32.mxu0 %v638_v0 }
  0x62   :  { %462 = vmatmul.mubr.f32.gmra.mrb[2].mxu1 %v73_v13 }
  0x63   :  { %211 = vmatmul.mubr.f32.gmra.mrb[4].mxu0 %v72_v12 }
  0x64   :  { %216 = vmatprep.mubr.f32.mxu0 %v638_v0 }
  0x67   :  { %217 = vmatmul.mubr.f32.gmra.mrb[6].mxu0 %v73_v13 }
 0x12e   :  { %v200_v22 = vpop.f32.mrb[0].mxu0 }
 0x12f   :  { %v364_v24 = vadd.f32 %v352_v20, %v200_v22  ;;  %v202_v25 = vpop.f32.mrb[1].mxu0 }
 0x130   :  { %v365_v26 = vadd.f32 %v356_v21, %v202_v25 }
 0x131   :  { %376 = vst [vmem:[#allocation9] sm:$0xff] %v364_v24  ;;  %v460_v27 = vpop.f32.mrb[0].mxu1 }
 0x132   :  { %377 = vst [vmem:[#allocation9 + $0x8] sm:$0xff] %v365_v26  ;;  %v206_v28 = vpop.f32.mrb[2].mxu0  ;;  %v369_v29 = vadd.f32 %v460_v27, %v360_v23  ;;  %v289_v0 = vpop.f32.mrb[1].mxu1 }
 0x133   :  { %v367_v30 = vadd.f32 %v352_v20, %v206_v28  ;;  %v208_v31 = vpop.f32.mrb[3].mxu0  ;;  %v366_v32 = vadd.f32 %v360_v23, %v289_v0 }
 0x134   :  { %v368_v33 = vadd.f32 %v356_v21, %v208_v31  ;;  %381 = vst [vmem:[#allocation9 + $0x28] sm:$0xff] %v369_v29 }
 0x135   :  { %379 = vst [vmem:[#allocation9 + $0x18] sm:$0xff] %v367_v30  ;;  %378 = vst [vmem:[#allocation9 + $0x10] sm:$0xff] %v366_v32  ;;  %v463_v34 = vpop.f32.mrb[2].mxu1 }
 0x136   :  { %380 = vst [vmem:[#allocation9 + $0x20] sm:$0xff] %v368_v33  ;;  %v212_v35 = vpop.f32.mrb[4].mxu0  ;;  %v375_v36 = vadd.f32 %v463_v34, %v360_v23  ;;  %v299_v37 = vpop.f32.mrb[3].mxu1 }
 0x137   :  { %v370_v38 = vadd.f32 %v352_v20, %v212_v35  ;;  %v214_v39 = vpop.f32.mrb[5].mxu0  ;;  %v372_v40 = vadd.f32 %v360_v23, %v299_v37 }
 0x138   :  { %v371_v41 = vadd.f32 %v356_v21, %v214_v39  ;;  %387 = vst [vmem:[#allocation9 + $0x58] sm:$0xff] %v375_v36 }
 0x139   :  { %382 = vst [vmem:[#allocation9 + $0x30] sm:$0xff] %v370_v38  ;;  %384 = vst [vmem:[#allocation9 + $0x40] sm:$0xff] %v372_v40 }
 0x13a   :  { %383 = vst [vmem:[#allocation9 + $0x38] sm:$0xff] %v371_v41  ;;  %v218_v42 = vpop.f32.mrb[6].mxu0 }
 0x13b   :  { %v373_v43 = vadd.f32 %v352_v20, %v218_v42  ;;  %v220_v44 = vpop.f32.mrb[7].mxu0 }
 0x13c   :  { %v374_v45 = vadd.f32 %v356_v21, %v220_v44 }
 0x13d   :  { %385 = vst [vmem:[#allocation9 + $0x48] sm:$0xff] %v373_v43 }
 0x13e   :  { %386 = vst [vmem:[#allocation9 + $0x50] sm:$0xff] %v374_v45 }
 0x13f   :  { %614 = shalt.err (!%p611_p0)
}
 0x140   :  { %s615_s30 = scalar_lea.hbm %s721_s3, 1536 }
 0x141   :  { %p616_p1 = scmp.ne.s32.totalorder %s721_s3, %s615_s30  ;;  %p619_p2 = scmp.lt.u32.totalorder %s615_s30, %s721_s3 }
 0x143   :  { %p621_p3 = pnand %p619_p2, %p616_p1 }
 0x145   :  { %624 = shalt.err (!%p621_p3)
}
 0x146   :  { %399 = dma.vmem_to_hbm [thread:$0]  %s394_s26, 1536, %s721_s3, [#allocation5], %s632_s22, %s632_s22, %s633_s23  }
 0x147   :  { %629 = dma.done.wait [#allocation5], 1536  }
 0x148   :  { %630 = vsyncadd [#allocation5], 4294965760 }
 0x149   :  { %403 = vsyncpa [#allocation4], 1 }
 0x14a   :  { %404 = vsyncpa [#allocation7], 1 }
 0x14b   :  { %405 = vsyncpa [#allocation5], 1 }

</bundles_post_ra>
